<compile_context>
chip_gen: v7x
topology: tpu7x:2x2x1
jax: 0.10.0
libtpu: 0.0.40
codegen_flags: <defaults>
</compile_context>

<pallas_src>
import functools

import jax
import jax.numpy as jnp
from jax import lax
from jax.experimental import pallas as pl
from jax.experimental.pallas import tpu as pltpu


def _weighted_ce_kernel(logits_ref, labels_ref, weights_ref, out_ref,
                        *, n_rows, tile_rows, inv_n):
    i = pl.program_id(0)

    # Init the resident (1, 1) accumulator on the first grid step.
    @pl.when(i == 0)
    def _():
        out_ref[...] = jnp.zeros_like(out_ref)

    # (tile, C) logits in native dtype -> f32 working copy in-kernel only.
    x = logits_ref[...].astype(jnp.float32)
    labels = labels_ref[...]                      # (tile, 1) int32
    w = weights_ref[...]                          # (tile, 1) float32
    num_classes = x.shape[-1]

    # Numerically stable log-sum-exp over the class (lane) dim.
    m = jnp.max(x, axis=-1, keepdims=True)        # (tile, 1)
    xs = x - m                                    # (tile, C), reused twice below
    logsum = jnp.log(jnp.sum(jnp.exp(xs), axis=-1, keepdims=True))      # (tile, 1)

    # Gather shifted label logit via one-hot masked reduction (no dynamic gather on TPU).
    cls_idx = lax.broadcasted_iota(jnp.int32, xs.shape, 1)              # (tile, C)
    label_shift = jnp.sum(jnp.where(cls_idx == labels, xs, 0.0),
                          axis=-1, keepdims=True)                       # (tile, 1)

    # loss = lse - x[label] = (m + logsum) - (m + label_shift) = logsum - label_shift
    ce = logsum - label_shift                     # (tile, 1)

    # Validity: row inside the real batch (ragged last tile) and label in range
    # (torch default ignore_index=-100 -> zero contribution). The jnp.where also
    # protects against nan/inf garbage from the out-of-bounds block region.
    row = i * tile_rows + lax.broadcasted_iota(jnp.int32, (tile_rows, 1), 0)
    valid = (row < n_rows) & (labels >= 0) & (labels < num_classes)
    wl = jnp.where(valid, ce * w, 0.0)            # (tile, 1)

    out_ref[...] += jnp.sum(wl, axis=(0, 1), keepdims=True)

    # Finalize: mean over N, then nan/inf -> 0.0 (matches the torch branch).
    @pl.when(i == pl.num_programs(0) - 1)
    def _():
        total = out_ref[...] * jnp.float32(inv_n)
        out_ref[...] = jnp.where(jnp.isnan(total) | jnp.isinf(total),
                                 jnp.zeros_like(total), total)


def _round_up(x, m):
    return (x + m - 1) // m * m


def weighted_cross_entropy_loss(outputs, labels, weights):
    """outputs: (N, C) float (any dtype), labels: (N,) int, weights: (N,) or scalar float."""
    N, C = outputs.shape
    itemsize = jnp.dtype(outputs.dtype).itemsize

    # Row-tile size: ~512K logits elements (~2 MiB f32 per working temporary),
    # multiple of 8 (sublane), never larger than the (rounded-up) batch.
    tn = max(8, min(512, (1 << 19) // max(1, C)))
    tn = min(tn, _round_up(N, 8))
    tn = max(8, (tn // 8) * 8)
    num_tiles = pl.cdiv(N, tn)

    labels2d = labels.astype(jnp.int32).reshape(N, 1)
    weights2d = jnp.broadcast_to(
        jnp.asarray(weights, dtype=jnp.float32), (N,)
    ).reshape(N, 1)

    # VMEM budget: 2x double-buffered native-dtype logits block, ~6 (tn, C) f32
    # temporaries (cast / shifted / exp / iota / select headroom), plus small
    # lane-padded (tn, 128) blocks for labels/weights/loss.
    est = 2 * tn * C * itemsize + 6 * tn * C * 4 + 8 * tn * 128 * 4
    vmem_limit = int(min(48 * 2**20, max(24 * 2**20, est + (4 << 20))))

    kernel = functools.partial(
        _weighted_ce_kernel, n_rows=N, tile_rows=tn, inv_n=1.0 / float(N))

    out = pl.pallas_call(
        kernel,
        out_shape=jax.ShapeDtypeStruct((1, 1), jnp.float32),
        grid_spec=pltpu.PrefetchScalarGridSpec(
            num_scalar_prefetch=0,
            grid=(num_tiles,),
            in_specs=[
                pl.BlockSpec((tn, C), lambda i: (i, 0)),   # native dtype (bf16 stays bf16)
                pl.BlockSpec((tn, 1), lambda i: (i, 0)),
                pl.BlockSpec((tn, 1), lambda i: (i, 0)),
            ],
            out_specs=pl.BlockSpec((1, 1), lambda i: (0, 0)),  # resident accumulator
        ),
        compiler_params=pltpu.CompilerParams(
            dimension_semantics=("arbitrary",),   # reduction axis (accumulator output)
            vmem_limit_bytes=vmem_limit,
        ),
    )(outputs, labels2d, weights2d)

    return out[0, 0]


def _reference(outputs, labels, weights):
    # pure-JAX reference for sanity check
    logp = jax.nn.log_softmax(outputs.astype(jnp.float32), axis=-1)
    nll = -jnp.take_along_axis(logp, labels[:, None].astype(jnp.int32), axis=-1)[:, 0]
    nll = jnp.where((labels >= 0) & (labels < outputs.shape[-1]), nll, 0.0)
    w = jnp.broadcast_to(jnp.asarray(weights, jnp.float32), nll.shape)
    m = jnp.mean(nll * w)
    return jnp.where(jnp.isnan(m) | jnp.isinf(m), 0.0, m)


if __name__ == "__main__":
    key = jax.random.PRNGKey(0)
    k1, k2, k3, k4, k5, k6 = jax.random.split(key, 6)

    # Case 1: small f32 case (batch=8, num_classes=32), N divides the tile exactly.
    N, C = 8, 32
    outputs = jax.random.normal(k1, (N, C), dtype=jnp.float32)
    labels = jax.random.randint(k2, (N,), 0, C, dtype=jnp.int32)
    weights = jax.random.uniform(k3, (N,), dtype=jnp.float32)

    loss = weighted_cross_entropy_loss(outputs, labels, weights)
    jax.block_until_ready(loss)
    ref = _reference(outputs, labels, weights)
    assert jnp.allclose(loss, ref, atol=1e-5, rtol=1e-5), (loss, ref)

    # Case 2: bf16 logits, N not a multiple of the row tile (exercises the ragged
    # last tile / in-kernel row masking path — no logits padding copy).
    N2, C2 = 13, 160
    outputs2 = jax.random.normal(k4, (N2, C2), dtype=jnp.bfloat16)
    labels2 = jax.random.randint(k5, (N2,), 0, C2, dtype=jnp.int32)
    weights2 = jax.random.uniform(k6, (N2,), dtype=jnp.float32)

    loss2 = weighted_cross_entropy_loss(outputs2, labels2, weights2)
    jax.block_until_ready(loss2)
    ref2 = _reference(outputs2, labels2, weights2)
    assert jnp.allclose(loss2, ref2, atol=1e-4, rtol=1e-4), (loss2, ref2)

    print("KERNEL_OK")
</pallas_src>

<mosaic_0001>
module attributes {stable_mosaic.version = 11 : i64} {
  func.func @_weighted_ce_kernel(%arg0: i32, %arg1: memref<8x32xf32, #tpu.memory_space<vmem>>, %arg2: memref<8x1xi32, #tpu.memory_space<vmem>>, %arg3: memref<8x1xf32, #tpu.memory_space<vmem>>, %arg4: memref<1x1xf32, #tpu.memory_space<vmem>>) attributes {dimension_semantics = [#tpu.dimension_semantics<arbitrary>], iteration_bounds = array<i64: 1>, scalar_prefetch = 0 : i64, scratch_operands = 0 : i64, tpu.core_type = #tpu.core_type<tc>, window_params = [{transform_indices = @transform_0, window_bounds = array<i64: 8, 32>}, {transform_indices = @transform_1, window_bounds = array<i64: 8, 1>}, {transform_indices = @transform_2, window_bounds = array<i64: 8, 1>}, {pipeline_mode = #tpu.pipeline_mode<synchronous>, transform_indices = @transform_3, window_bounds = array<i64: 1, 1>}]} {
    %c0_i32 = arith.constant 0 : i32
    %0 = arith.cmpi eq, %arg0, %c0_i32 : i32
    %1 = arith.extui %0 : i1 to i32
    %c0_i32_0 = arith.constant 0 : i32
    %2 = arith.cmpi ne, %1, %c0_i32_0 : i32
    scf.if %2 {
      %cst_19 = arith.constant 0.000000e+00 : f32
      %48 = vector.broadcast %cst_19 : f32 to vector<1x1xf32>
      %c0_20 = arith.constant 0 : index
      %c0_21 = arith.constant 0 : index
      %49 = vector.load %arg4[%c0_20, %c0_21] : memref<1x1xf32, #tpu.memory_space<vmem>>, vector<1x1xf32>
      tpu.vector_store %arg4[%c0_20, %c0_21], %48 {strides = array<i32>} : memref<1x1xf32, #tpu.memory_space<vmem>>, vector<1x1xf32>,
    } else {
    }
    %c0 = arith.constant 0 : index
    %c0_1 = arith.constant 0 : index
    %3 = vector.load %arg1[%c0, %c0_1] : memref<8x32xf32, #tpu.memory_space<vmem>>, vector<8x32xf32>
    %c0_2 = arith.constant 0 : index
    %c0_3 = arith.constant 0 : index
    %4 = vector.load %arg2[%c0_2, %c0_3] : memref<8x1xi32, #tpu.memory_space<vmem>>, vector<8x1xi32>
    %c0_4 = arith.constant 0 : index
    %c0_5 = arith.constant 0 : index
    %5 = vector.load %arg3[%c0_4, %c0_5] : memref<8x1xf32, #tpu.memory_space<vmem>>, vector<8x1xf32>
    %cst = arith.constant dense<0xFF800000> : vector<8xf32>
    %6 = vector.multi_reduction <maximumf>, %3, %cst [1] : vector<8x32xf32> to vector<8xf32>
    %7 = vector.shape_cast %6 : vector<8xf32> to vector<8x1xf32>
    %8 = vector.broadcast %7 : vector<8x1xf32> to vector<8x32xf32>
    %9 = arith.subf %3, %8 : vector<8x32xf32>
    %10 = math.exp %9 : vector<8x32xf32>
    %cst_6 = arith.constant dense<0.000000e+00> : vector<8xf32>
    %11 = vector.multi_reduction <add>, %10, %cst_6 [1] : vector<8x32xf32> to vector<8xf32>
    %12 = vector.shape_cast %11 : vector<8xf32> to vector<8x1xf32>
    %13 = math.log %12 : vector<8x1xf32>
    %14 = tpu.iota {dimensions = array<i32: 1>} : vector<8x32xi32>
    %15 = vector.broadcast %4 : vector<8x1xi32> to vector<8x32xi32>
    %16 = arith.cmpi eq, %14, %15 : vector<8x32xi32>
    %cst_7 = arith.constant 0.000000e+00 : f32
    %17 = vector.broadcast %cst_7 : f32 to vector<8x32xf32>
    %18 = arith.select %16, %9, %17 : vector<8x32xi1>, vector<8x32xf32>
    %cst_8 = arith.constant dense<0.000000e+00> : vector<8xf32>
    %19 = vector.multi_reduction <add>, %18, %cst_8 [1] : vector<8x32xf32> to vector<8xf32>
    %20 = vector.shape_cast %19 : vector<8xf32> to vector<8x1xf32>
    %21 = arith.subf %13, %20 : vector<8x1xf32>
    %c8_i32 = arith.constant 8 : i32
    %22 = arith.muli %arg0, %c8_i32 : i32
    %23 = tpu.iota {dimensions = array<i32: 0>} : vector<8x1xi32>
    %24 = vector.broadcast %22 : i32 to vector<8x1xi32>
    %25 = arith.addi %24, %23 : vector<8x1xi32>
    %c8_i32_9 = arith.constant 8 : i32
    %26 = vector.broadcast %c8_i32_9 : i32 to vector<8x1xi32>
    %27 = arith.cmpi slt, %25, %26 : vector<8x1xi32>
    %c0_i32_10 = arith.constant 0 : i32
    %28 = vector.broadcast %c0_i32_10 : i32 to vector<8x1xi32>
    %29 = arith.cmpi sge, %4, %28 : vector<8x1xi32>
    %30 = arith.andi %27, %29 : vector<8x1xi1>
    %c32_i32 = arith.constant 32 : i32
    %31 = vector.broadcast %c32_i32 : i32 to vector<8x1xi32>
    %32 = arith.cmpi slt, %4, %31 : vector<8x1xi32>
    %33 = arith.andi %30, %32 : vector<8x1xi1>
    %34 = arith.mulf %21, %5 : vector<8x1xf32>
    %cst_11 = arith.constant 0.000000e+00 : f32
    %35 = vector.broadcast %cst_11 : f32 to vector<8x1xf32>
    %36 = arith.select %33, %34, %35 : vector<8x1xi1>, vector<8x1xf32>
    %c0_12 = arith.constant 0 : index
    %c0_13 = arith.constant 0 : index
    %37 = vector.load %arg4[%c0_12, %c0_13] : memref<1x1xf32, #tpu.memory_space<vmem>>, vector<1x1xf32>
    %38 = vector.shape_cast %36 : vector<8x1xf32> to vector<1x8x1xf32>
    %cst_14 = arith.constant dense<0.000000e+00> : vector<1xf32>
    %39 = vector.multi_reduction <add>, %38, %cst_14 [1, 2] : vector<1x8x1xf32> to vector<1xf32>
    %40 = vector.shape_cast %39 : vector<1xf32> to vector<1x1x1xf32>
    %41 = vector.extract %40[0, 0, 0] : f32 from vector<1x1x1xf32>
    %42 = vector.broadcast %41 : f32 to vector<1x1xf32>
    %43 = arith.addf %37, %42 : vector<1x1xf32>
    %c0_15 = arith.constant 0 : index
    %c0_16 = arith.constant 0 : index
    %44 = vector.load %arg4[%c0_15, %c0_16] : memref<1x1xf32, #tpu.memory_space<vmem>>, vector<1x1xf32>
    tpu.vector_store %arg4[%c0_15, %c0_16], %43 {strides = array<i32>} : memref<1x1xf32, #tpu.memory_space<vmem>>, vector<1x1xf32>,
    %c0_i32_17 = arith.constant 0 : i32
    %45 = arith.cmpi eq, %arg0, %c0_i32_17 : i32
    %46 = arith.extui %45 : i1 to i32
    %c0_i32_18 = arith.constant 0 : i32
    %47 = arith.cmpi ne, %46, %c0_i32_18 : i32
    scf.if %47 {
      %c0_19 = arith.constant 0 : index
      %c0_20 = arith.constant 0 : index
      %48 = vector.load %arg4[%c0_19, %c0_20] : memref<1x1xf32, #tpu.memory_space<vmem>>, vector<1x1xf32>
      %cst_21 = arith.constant 1.250000e-01 : f32
      %49 = vector.broadcast %cst_21 : f32 to vector<1x1xf32>
      %50 = arith.mulf %48, %49 : vector<1x1xf32>
      %51 = arith.cmpf one, %50, %50 : vector<1x1xf32>
      %52 = math.absf %50 : vector<1x1xf32>
      %cst_22 = arith.constant 0x7F800000 : f32
      %53 = vector.broadcast %cst_22 : f32 to vector<1x1xf32>
      %54 = arith.cmpf oeq, %52, %53 : vector<1x1xf32>
      %55 = arith.ori %51, %54 : vector<1x1xi1>
      %cst_23 = arith.constant 0.000000e+00 : f32
      %56 = vector.broadcast %cst_23 : f32 to vector<1x1xf32>
      %57 = arith.select %55, %56, %50 : vector<1x1xi1>, vector<1x1xf32>
      %c0_24 = arith.constant 0 : index
      %c0_25 = arith.constant 0 : index
      %58 = vector.load %arg4[%c0_24, %c0_25] : memref<1x1xf32, #tpu.memory_space<vmem>>, vector<1x1xf32>
      tpu.vector_store %arg4[%c0_24, %c0_25], %57 {strides = array<i32>} : memref<1x1xf32, #tpu.memory_space<vmem>>, vector<1x1xf32>,
    } else {
    }
    return
  }
  func.func @transform_0(%arg0: i32) -> (i32, i32) {
    %c0_i32 = arith.constant 0 : i32
    %c0_i32_0 = arith.constant 0 : i32
    return %arg0, %c0_i32 : i32, i32
  }
  func.func @transform_1(%arg0: i32) -> (i32, i32) {
    %c0_i32 = arith.constant 0 : i32
    %c0_i32_0 = arith.constant 0 : i32
    return %arg0, %c0_i32 : i32, i32
  }
  func.func @transform_2(%arg0: i32) -> (i32, i32) {
    %c0_i32 = arith.constant 0 : i32
    %c0_i32_0 = arith.constant 0 : i32
    return %arg0, %c0_i32 : i32, i32
  }
  func.func @transform_3(%arg0: i32) -> (i32, i32) {
    %c0_i32 = arith.constant 0 : i32
    %c0_i32_0 = arith.constant 0 : i32
    %c0_i32_1 = arith.constant 0 : i32
    return %c0_i32, %c0_i32_0 : i32, i32
  }
}

</mosaic_0001>

<bundles_post_ra>
// kernel: tpu_custom_call.1
= control target key start
LH: loop header
LB: loop body
LE: loop exit
PB: predicated region body
PF: predicated region fallthrough
CT: control target
= control target key end

     0   :  { %vm24_vm0 = vcmask 261120   ;;  %s184_s0 = inlined_call_operand.vmem [shape: f32[8,32], index: 0, kind: input, shape index: {}]   ;;  %s185_s1 = inlined_call_operand.vmem [shape: s32[8,1], index: 1, kind: input, shape index: {}]   ;;  %s186_s2 = inlined_call_operand.vmem [shape: f32[8,1], index: 2, kind: input, shape index: {}]   ;;  %s187_s3 = inlined_call_operand.hbm [shape: f32[1,1], index: 3, kind: output, shape index: {}]  }
   0x1   :  { %v21_v0 = vld [vmem:[%s184_s0] sm:$0xff] }
   0x2   :  { %8 = vsyncpa [#allocation3], 0  ;;  %v25_v1 = vsel %vm24_vm0, %v21_v0, -inf  ;;  %v134_v2 = vmov 0   ;;  %v22_v3 = vld [vmem:[%s185_s1] sm:$0xff]  ;;  %v36_v7 = vlaneseq  ;;  %vm60_vm5 = vcmask 7168  }
   0x3   :  { %105 = vset.pattern.permute.xlu0 %v134_v2  ;;  %vm53_vm2 = vcmp.ge.s32.totalorder %v22_v3, 0  ;;  %vm55_vm3 = vcmp.lt.s32.totalorder %v22_v3, 32  ;;  %v23_v17 = vld [vmem:[%s186_s2] sm:$0xff]  ;;  %vm19_vm6 = vcmask 0   ;;  %v135_v23 = vmov 0.0   ;;  %s136_s16 = smov [#allocation2]  }
   0x4   :  { %26 = vmax.xlane.f32.xlu0 %v25_v1  ;;  %v37_v8 = vand.u32 127, %v36_v7  ;;  %vm56_vm4 = vmand %vm53_vm2, %vm55_vm3  ;;  %20 = vst.msk [vmem:[#allocation2] sm:$0x1] %vm19_vm6, %v135_v23  ;;  %s92_s17 = sshll.u32 %s136_s16, 4  ;;  %s93_s17 = int_to_ptr.vmem [resolvable:$true] %s92_s17 }
   0x5   :  { %s110_s18 = scalar_lea.vmem %s93_s17, 16  ;;  %s114_s19 = scalar_lea.vmem %s93_s17, 32 }
   0x6   :  { %p111_p0 = scmp.ne.s32.totalorder %s93_s17, %s110_s18  ;;  %p115_p1 = scmp.lt.s32.totalorder %s93_s17, %s93_s17 }
   0x7   :  { %p116_p2 = scmp.lt.s32.totalorder %s114_s19, %s110_s18 }
   0x9   :  { %p117_p3 = por %p116_p2, %p115_p1 }
   0xb   :  { %v59_v31 = vld [vmem:[#allocation2] sm:$0x1]  ;;  %p118_p4 = pnand %p117_p3, %p111_p0 }
  0x1a   :  { %39 = vperm.xlu0 %105, %v22_v3  }
  0x91   :  { %v27_v4 = vpop.xlane.xlu0 %26 }
  0x92   :  { %v28_v5 = vsub.f32 %v21_v0, %v27_v4 }
  0x94   :  { %v29_v6 = vmul.f32 1.442695, %v28_v5 }
  0x96   :  { %106 = vpow2.f32 %v29_v6 }
  0x99   :  { %v40_v9 = vpop.permute.xlu0 %39 }
  0x9a   :  { %vm41_vm1 = vcmp.eq.s32.totalorder %v37_v8, %v40_v9 }
  0x9b   :  { %v42_v12 = vsel %vm41_vm1, %v28_v5, 0.0 }
  0x9c   :  { %v43_v13 = vsel %vm24_vm0, %v42_v12, 0.0 }
  0xa0   :  { %v107_v10 = vpop.eup %106 }
  0xa1   :  { %v31_v11 = vsel %vm24_vm0, %v107_v10, 0.0 }
  0xa2   :  { %32 = vadd.xlane.f32.xlu1 %v31_v11 }
  0xa6   :  { %44 = vadd.xlane.f32.xlu1 %v43_v13 }
 0x12f   :  { %v33_v14 = vpop.xlane.xlu1 %32 }
 0x130   :  { %108 = vlog2.f32 %v33_v14 }
 0x133   :  { %v45_v18 = vpop.xlane.xlu1 %44 }
 0x13a   :  { %v109_v15 = vpop.eup %108 }
 0x13b   :  { %v35_v16 = vmul.f32 0.6931472, %v109_v15 }
 0x13d   :  { %v46_v19 = vsub.f32 %v35_v16, %v45_v18 }
 0x13f   :  { %v57_v20 = vmul.f32 %v46_v19, %v23_v17 }
 0x141   :  { %v58_v21 = vsel %vm56_vm4, %v57_v20, 0.0 }
 0x142   :  { %v61_v22 = vsel %vm60_vm5, %v58_v21, 0.0 }
 0x143   :  { %62 = vadd.xlane.f32.xlu1 %v61_v22 }
 0x1d0   :  { %v63_v24 = vpop.xlane.xlu1 %62 }
 0x1d1   :  { %v64_v25 = vrot.slane %v63_v24, 4 }
 0x1d3   :  { %v65_v26 = vadd.f32 %v64_v25, %v63_v24 }
 0x1d5   :  { %v66_v27 = vrot.slane %v65_v26, 2 }
 0x1d7   :  { %v67_v28 = vadd.f32 %v66_v27, %v65_v26 }
 0x1d9   :  { %v68_v29 = vrot.slane %v67_v28, 1 }
 0x1db   :  { %v69_v30 = vadd.f32 %v68_v29, %v67_v28 }
 0x1dd   :  { %100 = vpush %v69_v30 }
 0x20e   :  { %s101_s2 = spop %100 }
 0x20f   :  { %v71_v32 = vstv %s101_s2 }
 0x210   :  { %v72_v33 = vadd.f32 %v71_v32, %v59_v31 }
 0x212   :  { %74 = vst.msk [vmem:[#allocation2] sm:$0x1] %vm19_vm6, %v72_v33 }
 0x219   :  { %v78_v34 = vld [vmem:[#allocation2] sm:$0x1] }
 0x21a   :  { %v79_v35 = vmul.f32 0.125, %v78_v34 }
 0x21c   :  { %v81_v36 = vand.u32 2147483647, %v79_v35  ;;  %vm80_vm7 = vcmp.ne.f32.partialorder %v79_v35, %v79_v35 }
 0x21e   :  { %vm82_vm8 = vcmp.eq.f32.partialorder %v81_v36, inf }
 0x21f   :  { %vm83_vm9 = vmor %vm80_vm7, %vm82_vm8 }
 0x220   :  { %v84_v37 = vsel %vm83_vm9, 0.0, %v79_v35 }
 0x221   :  { %85 = vst.msk [vmem:[#allocation2] sm:$0x1] %vm19_vm6, %v84_v37 }
 0x222   :  { %121 = shalt.err (!%p118_p4)
}
 0x223   :  { %s122_s22 = scalar_lea.hbm %s187_s3, 16 }
 0x224   :  { %p123_p5 = scmp.ne.s32.totalorder %s187_s3, %s122_s22  ;;  %p126_p6 = scmp.lt.u32.totalorder %s122_s22, %s187_s3 }
 0x226   :  { %p128_p7 = pnand %p126_p6, %p123_p5 }
 0x228   :  { %131 = shalt.err (!%p128_p7)
}
 0x229   :  { %95 = dma.vmem_to_hbm [thread:$0]  %s93_s17, 16, %s187_s3, [#allocation3]  }
 0x22a   :  { %132 = dma.done.wait [#allocation3], 16  }
 0x22b   :  { %133 = vsyncadd [#allocation3], 4294967280 }
 0x22c   :  { %99 = vsyncpa [#allocation3], 1 }

</bundles_post_ra>
